<compile_context>
chip_gen: v6e
topology: v6e:2x2x1
jax: 0.10.0
libtpu: 0.0.40
codegen_flags: <defaults>
</compile_context>

<pallas_src>
import numpy as np
import jax
import jax.numpy as jnp
from jax.experimental import pallas as pl
from jax.experimental.pallas import tpu as pltpu


# ----------------------------------------------------------------------------
# Host-side glue: antialiased bicubic interpolation matrices (PyTorch semantics)
# ----------------------------------------------------------------------------
def _cubic_aa(x, a=-0.5):
    x = abs(x)
    if x < 1.0:
        return ((a + 2.0) * x - (a + 3.0)) * x * x + 1.0
    if x < 2.0:
        return (((x - 5.0) * x + 8.0) * x - 4.0) * a
    return 0.0


def interp_matrix_aa(in_size, out_size):
    """A (out_size, in_size) s.t. y = A @ x matches
    F.interpolate(mode='bicubic', antialias=True, align_corners=False)
    applied along one axis (torch's separable AA resampling)."""
    scale = in_size / out_size
    support = 2.0 * scale if scale >= 1.0 else 2.0
    invscale = 1.0 / scale if scale >= 1.0 else 1.0
    A = np.zeros((out_size, in_size), dtype=np.float64)
    for i in range(out_size):
        center = scale * (i + 0.5)
        xmin = max(int(center - support + 0.5), 0)
        xmax = min(int(center + support + 0.5), in_size)
        w = np.array([_cubic_aa((j + xmin - center + 0.5) * invscale)
                      for j in range(xmax - xmin)], dtype=np.float64)
        w /= w.sum()
        A[i, xmin:xmax] = w
    return A.astype(np.float32)


# ----------------------------------------------------------------------------
# Host-side glue: Conv2d weights -> single-matmul Toeplitz operand
# ----------------------------------------------------------------------------
def conv_to_cat_operands(conv_w, conv_b, W):
    """Re-lays out Conv2d weights (Cout, Cin, K, K) so the 'same' KxK conv on a
    channel-packed row slab becomes ONE matmul  Z = bias + Xcat @ Mcat,  where
    Xcat = [shift(h-pad) X | ... | X | ... | shift(h+pad) X]  (columns) and
    Mcat[kh*Cin*W + ci*W + w_in, co*W + w_out] = w[co, ci, kh, kw]
    with w_in = w_out + kw - pad (dropped when out of bounds -> zero padding)."""
    Cout, Cin, K, _ = conv_w.shape
    pad = K // 2
    wnp = np.asarray(conv_w, dtype=np.float32)
    mcat = np.zeros((K * Cin * W, Cout * W), np.float32)
    for kh in range(K):
        for kw in range(K):
            for w_out in range(W):
                w_in = w_out + kw - pad
                if not (0 <= w_in < W):
                    continue
                for ci in range(Cin):
                    for co in range(Cout):
                        mcat[kh * Cin * W + ci * W + w_in,
                             co * W + w_out] = wnp[co, ci, kh, kw]
    brow = np.repeat(np.asarray(conv_b, dtype=np.float32), W)[None, :]  # (1, Cout*W)
    return mcat, brow


def _block_diag(m, n):
    r, c = m.shape
    out = np.zeros((n * r, n * c), m.dtype)
    for i in range(n):
        out[i * r:(i + 1) * r, i * c:(i + 1) * c] = m
    return out


# ----------------------------------------------------------------------------
# Pallas kernel
# ----------------------------------------------------------------------------
def make_cno_block_call(num_steps, MtH, KCinW, CoutW, BtH2, Cout2W, BtHo, CoutWo,
                        neg_slope=0.01):

    def kernel(x_ref, mcat_ref, b_ref, ahu_ref, bdwu_ref, ahd_ref, bdwd_ref,
               o_ref):
        # x_ref    : (Bt*H, 3*Cin*W)    bf16  batch-stacked, row-shift-concat input
        # mcat_ref : (3*Cin*W, Cout*W)  bf16  Toeplitz-expanded conv weights
        # b_ref    : (1, Cout*W)        f32   bias broadcast row
        # ahu_ref  : (Bt*2H, Bt*H)      bf16  block-diag (over Bt) row up-interp
        # bdwu_ref : (Cout*W, Cout*2W)  bf16  block-diag (over Cout) col up-interp
        # ahd_ref  : (Bt*Ho, Bt*2H)     bf16  block-diag (over Bt) row down-interp
        # bdwd_ref : (Cout*2W, Cout*Wo) bf16  block-diag (over Cout) col down-interp
        # o_ref    : (Bt*Ho, Cout*Wo)   f32   lane-dense output slab

        # ---- 3x3 "same" conv == ONE MXU matmul (bf16 in, f32 accumulate) ----
        z = b_ref[...] + jnp.dot(x_ref[...], mcat_ref[...],
                                 preferred_element_type=jnp.float32)
        # z: (Bt*H, Cout*W) f32 -- all images on sublanes, all channels on lanes

        # ---- CNO_LReLu: bicubic-AA upsample x2 (rows then cols) ----
        u = jnp.dot(ahu_ref[...], z.astype(jnp.bfloat16),
                    preferred_element_type=jnp.float32)        # (Bt*2H, Cout*W)
        u = jnp.dot(u.astype(jnp.bfloat16), bdwu_ref[...],
                    preferred_element_type=jnp.float32)        # (Bt*2H, Cout*2W)
        u = jnp.where(u >= 0.0, u, neg_slope * u)              # LeakyReLU, f32 VPU

        # ---- bicubic-AA downsample to out_size ----
        d = jnp.dot(ahd_ref[...], u.astype(jnp.bfloat16),
                    preferred_element_type=jnp.float32)        # (Bt*Ho, Cout*2W)
        d = jnp.dot(d.astype(jnp.bfloat16), bdwd_ref[...],
                    preferred_element_type=jnp.float32)        # (Bt*Ho, Cout*Wo)

        o_ref[...] = d.astype(o_ref.dtype)                     # lane-dense store

    in_specs = [
        pl.BlockSpec((MtH, KCinW), lambda i: (i, 0)),        # Xcat slab
        pl.BlockSpec((KCinW, CoutW), lambda i: (0, 0)),      # Mcat   (invariant)
        pl.BlockSpec((1, CoutW), lambda i: (0, 0)),          # bias   (invariant)
        pl.BlockSpec((BtH2, MtH), lambda i: (0, 0)),         # Ahu_bd (invariant)
        pl.BlockSpec((CoutW, Cout2W), lambda i: (0, 0)),     # Awu^T  (invariant)
        pl.BlockSpec((BtHo, BtH2), lambda i: (0, 0)),        # Ahd_bd (invariant)
        pl.BlockSpec((Cout2W, CoutWo), lambda i: (0, 0)),    # Awd^T  (invariant)
    ]
    out_specs = pl.BlockSpec((BtHo, CoutWo), lambda i: (i, 0))

    flops = 2 * num_steps * (MtH * KCinW * CoutW
                             + BtH2 * MtH * CoutW
                             + BtH2 * CoutW * Cout2W
                             + BtHo * BtH2 * Cout2W
                             + BtHo * Cout2W * CoutWo)
    bytes_accessed = (2 * num_steps * MtH * KCinW          # bf16 input slabs
                      + 4 * num_steps * BtHo * CoutWo      # f32 output slabs
                      + 2 * (KCinW * CoutW + BtH2 * MtH + CoutW * Cout2W
                             + BtHo * BtH2 + Cout2W * CoutWo)
                      + 4 * CoutW)

    return pl.pallas_call(
        kernel,
        out_shape=jax.ShapeDtypeStruct((num_steps * BtHo, CoutWo), jnp.float32),
        grid_spec=pltpu.PrefetchScalarGridSpec(
            num_scalar_prefetch=0,
            grid=(num_steps,),
            in_specs=in_specs,
            out_specs=out_specs),
        compiler_params=pltpu.CompilerParams(
            dimension_semantics=("parallel",),
            vmem_limit_bytes=64 * 1024 * 1024),
        cost_estimate=pl.CostEstimate(flops=flops, transcendentals=0,
                                      bytes_accessed=bytes_accessed),
    )


def cno_block_forward(x, conv_w, conv_b, Ahu, Awu, Ahd, Awd, neg_slope=0.01):
    B, Cin, H, W = x.shape
    Cout, _, K, _ = conv_w.shape
    pad = K // 2
    H2, W2 = Ahu.shape[0], Awu.shape[0]
    Ho, Wo = Ahd.shape[0], Awd.shape[0]

    # ---- batch tiling: Bt images per grid step, stacked on the M/sublane axis.
    # Bt capped (~64//H) so the f32 (Bt*2H, Cout*2W) intermediate stays ~32 vregs;
    # >=2 grid steps kept when B>=2 so both v7x TensorCores get work.
    bt_cap = max(1, 64 // H)
    Bt = max(1, min(bt_cap, (B + 1) // 2)) if B > 1 else 1
    num_steps = -(-B // Bt)
    B_pad = num_steps * Bt

    # ---- host-side weight re-layout (pure glue, data independent) ----
    mcat, brow = conv_to_cat_operands(conv_w, conv_b, W)        # (K*Cin*W, Cout*W)
    bd_ahu = _block_diag(np.asarray(Ahu, np.float32), Bt)       # (Bt*2H, Bt*H)
    bd_ahd = _block_diag(np.asarray(Ahd, np.float32), Bt)       # (Bt*Ho, Bt*2H)
    bd_awu = _block_diag(np.asarray(Awu, np.float32).T, Cout)   # (Cout*W, Cout*2W)
    bd_awd = _block_diag(np.asarray(Awd, np.float32).T, Cout)   # (Cout*2W, Cout*Wo)

    # ---- layout plumbing (outside the kernel, zero MACs): pack channels onto
    # the lane axis and concatenate row-shifted copies so the conv is ONE matmul.
    x_pk = jnp.transpose(x, (0, 2, 1, 3)).reshape(B, H, Cin * W)
    shifted = []
    for kh in range(K):
        s = kh - pad                              # need x[h + s], zero outside
        if s == 0:
            shifted.append(x_pk)
        elif s > 0:
            shifted.append(jnp.pad(x_pk, ((0, 0), (0, s), (0, 0)))[:, s:, :])
        else:
            shifted.append(jnp.pad(x_pk, ((0, 0), (-s, 0), (0, 0)))[:, :H, :])
    xcat = jnp.concatenate(shifted, axis=-1)      # (B, H, K*Cin*W)
    if B_pad > B:
        xcat = jnp.pad(xcat, ((0, B_pad - B), (0, 0), (0, 0)))
    xcat = xcat.reshape(B_pad * H, K * Cin * W).astype(jnp.bfloat16)

    call = make_cno_block_call(num_steps, Bt * H, K * Cin * W, Cout * W,
                               Bt * H2, Cout * W2, Bt * Ho, Cout * Wo,
                               neg_slope=neg_slope)
    out_flat = call(xcat,
                    jnp.asarray(mcat, jnp.bfloat16),
                    jnp.asarray(brow, jnp.float32),
                    jnp.asarray(bd_ahu, jnp.bfloat16),
                    jnp.asarray(bd_awu, jnp.bfloat16),
                    jnp.asarray(bd_ahd, jnp.bfloat16),
                    jnp.asarray(bd_awd, jnp.bfloat16))
    # (B_pad*Ho, Cout*Wo) -> (B, Cout, Ho, Wo)
    out = out_flat.reshape(B_pad, Ho, Cout, Wo)[:B]
    return jnp.transpose(out, (0, 2, 1, 3))


# ----------------------------------------------------------------------------
# Pure-JAX reference (same math, f32/highest precision, for a sanity check)
# ----------------------------------------------------------------------------
def reference(x, conv_w, conv_b, Ahu, Awu, Ahd, Awd, neg_slope=0.01):
    y = jax.lax.conv_general_dilated(
        x, conv_w, window_strides=(1, 1), padding="SAME",
        dimension_numbers=("NCHW", "OIHW", "NCHW"),
        precision=jax.lax.Precision.HIGHEST)
    y = y + conv_b[None, :, None, None]
    up = jnp.einsum("uh,bchw->bcuw", Ahu, y, precision="highest")
    up = jnp.einsum("vw,bchw->bchv", Awu, up, precision="highest")
    up = jnp.where(up >= 0.0, up, neg_slope * up)
    dn = jnp.einsum("uh,bchw->bcuw", Ahd, up, precision="highest")
    dn = jnp.einsum("vw,bchw->bchv", Awd, dn, precision="highest")
    return dn


# TODO(synk): use_bn=True (BatchNorm2d) path not implemented; default
# use_bn=False -> nn.Identity, which is what is reproduced here.
# TODO(synk): only the problem_dim=2 branch of CNOBlock/CNO_LReLu is implemented.

if __name__ == "__main__":
    B, Cin, Cout = 2, 4, 8
    H = W = 16              # in_size
    Ho = Wo = 16            # out_size
    K = 3

    key = jax.random.PRNGKey(0)
    k1, k2, k3 = jax.random.split(key, 3)
    x = jax.random.normal(k1, (B, Cin, H, W), jnp.float32)
    # deterministic Conv2d-style init (uniform in +-1/sqrt(fan_in))
    bound = 1.0 / float(np.sqrt(Cin * K * K))
    conv_w = jax.random.uniform(k2, (Cout, Cin, K, K), jnp.float32, -bound, bound)
    conv_b = jax.random.uniform(k3, (Cout,), jnp.float32, -bound, bound)

    # precompute separable antialiased-bicubic interpolation matrices
    Ahu = jnp.asarray(interp_matrix_aa(H, 2 * H))      # (2H, H)
    Awu = jnp.asarray(interp_matrix_aa(W, 2 * W))      # (2W, W)
    Ahd = jnp.asarray(interp_matrix_aa(2 * H, Ho))     # (Ho, 2H)
    Awd = jnp.asarray(interp_matrix_aa(2 * W, Wo))     # (Wo, 2W)

    out = cno_block_forward(x, conv_w, conv_b, Ahu, Awu, Ahd, Awd)
    out = jax.block_until_ready(out)

    ref = jax.block_until_ready(reference(x, conv_w, conv_b, Ahu, Awu, Ahd, Awd))
    assert out.shape == (B, Cout, Ho, Wo)
    np.testing.assert_allclose(np.asarray(out), np.asarray(ref),
                               rtol=2e-2, atol=2e-2)
    print("KERNEL_OK")
</pallas_src>

<mosaic_0001>
module attributes {stable_mosaic.version = 11 : i64} {
  func.func @kernel(%arg0: i32, %arg1: memref<16x192xbf16, #tpu.memory_space<vmem>>, %arg2: memref<192x128xbf16, #tpu.memory_space<vmem>>, %arg3: memref<1x128xf32, #tpu.memory_space<vmem>>, %arg4: memref<32x16xbf16, #tpu.memory_space<vmem>>, %arg5: memref<128x256xbf16, #tpu.memory_space<vmem>>, %arg6: memref<16x32xbf16, #tpu.memory_space<vmem>>, %arg7: memref<256x128xbf16, #tpu.memory_space<vmem>>, %arg8: memref<16x128xf32, #tpu.memory_space<vmem>>) attributes {dimension_semantics = [#tpu.dimension_semantics<parallel>], iteration_bounds = array<i64: 2>, scalar_prefetch = 0 : i64, scratch_operands = 0 : i64, tpu.core_type = #tpu.core_type<tc>, window_params = [{transform_indices = @transform_0, window_bounds = array<i64: 16, 192>}, {pipeline_mode = #tpu.pipeline_mode<synchronous>, transform_indices = @transform_1, window_bounds = array<i64: 192, 128>}, {pipeline_mode = #tpu.pipeline_mode<synchronous>, transform_indices = @transform_2, window_bounds = array<i64: 1, 128>}, {pipeline_mode = #tpu.pipeline_mode<synchronous>, transform_indices = @transform_3, window_bounds = array<i64: 32, 16>}, {pipeline_mode = #tpu.pipeline_mode<synchronous>, transform_indices = @transform_4, window_bounds = array<i64: 128, 256>}, {pipeline_mode = #tpu.pipeline_mode<synchronous>, transform_indices = @transform_5, window_bounds = array<i64: 16, 32>}, {pipeline_mode = #tpu.pipeline_mode<synchronous>, transform_indices = @transform_6, window_bounds = array<i64: 256, 128>}, {transform_indices = @transform_7, window_bounds = array<i64: 16, 128>}]} {
    %c0 = arith.constant 0 : index
    %c0_0 = arith.constant 0 : index
    %0 = vector.load %arg3[%c0, %c0_0] : memref<1x128xf32, #tpu.memory_space<vmem>>, vector<1x128xf32>
    %c0_1 = arith.constant 0 : index
    %c0_2 = arith.constant 0 : index
    %1 = vector.load %arg1[%c0_1, %c0_2] : memref<16x192xbf16, #tpu.memory_space<vmem>>, vector<16x192xbf16>
    %c0_3 = arith.constant 0 : index
    %c0_4 = arith.constant 0 : index
    %2 = vector.load %arg2[%c0_3, %c0_4] : memref<192x128xbf16, #tpu.memory_space<vmem>>, vector<192x128xbf16>
    %cst = arith.constant dense<0.000000e+00> : vector<16x128xf32>
    %3 = tpu.matmul %1, %2, %cst {dimension_numbers = #tpu.dot_dimension_numbers<[1], [0], [0], [1], [0, 0, 1, 1], [], []>} : vector<16x192xbf16>, vector<192x128xbf16>, vector<16x128xf32> -> vector<16x128xf32>
    %4 = vector.broadcast %0 : vector<1x128xf32> to vector<16x128xf32>
    %5 = arith.addf %4, %3 : vector<16x128xf32>
    %c0_5 = arith.constant 0 : index
    %c0_6 = arith.constant 0 : index
    %6 = vector.load %arg4[%c0_5, %c0_6] : memref<32x16xbf16, #tpu.memory_space<vmem>>, vector<32x16xbf16>
    %7 = arith.truncf %5 : vector<16x128xf32> to vector<16x128xbf16>
    %cst_7 = arith.constant dense<0.000000e+00> : vector<32x128xf32>
    %8 = tpu.matmul %6, %7, %cst_7 {dimension_numbers = #tpu.dot_dimension_numbers<[1], [0], [0], [1], [0, 0, 1, 1], [], []>} : vector<32x16xbf16>, vector<16x128xbf16>, vector<32x128xf32> -> vector<32x128xf32>
    %9 = arith.truncf %8 : vector<32x128xf32> to vector<32x128xbf16>
    %c0_8 = arith.constant 0 : index
    %c0_9 = arith.constant 0 : index
    %10 = vector.load %arg5[%c0_8, %c0_9] : memref<128x256xbf16, #tpu.memory_space<vmem>>, vector<128x256xbf16>
    %cst_10 = arith.constant dense<0.000000e+00> : vector<32x256xf32>
    %11 = tpu.matmul %9, %10, %cst_10 {dimension_numbers = #tpu.dot_dimension_numbers<[1], [0], [0], [1], [0, 0, 1, 1], [], []>} : vector<32x128xbf16>, vector<128x256xbf16>, vector<32x256xf32> -> vector<32x256xf32>
    %cst_11 = arith.constant 0.000000e+00 : f32
    %12 = vector.broadcast %cst_11 : f32 to vector<32x256xf32>
    %13 = arith.cmpf oge, %11, %12 : vector<32x256xf32>
    %cst_12 = arith.constant 0.00999999977 : f32
    %14 = vector.broadcast %cst_12 : f32 to vector<32x256xf32>
    %15 = arith.mulf %14, %11 : vector<32x256xf32>
    %16 = arith.select %13, %11, %15 : vector<32x256xi1>, vector<32x256xf32>
    %c0_13 = arith.constant 0 : index
    %c0_14 = arith.constant 0 : index
    %17 = vector.load %arg6[%c0_13, %c0_14] : memref<16x32xbf16, #tpu.memory_space<vmem>>, vector<16x32xbf16>
    %18 = arith.truncf %16 : vector<32x256xf32> to vector<32x256xbf16>
    %cst_15 = arith.constant dense<0.000000e+00> : vector<16x256xf32>
    %19 = tpu.matmul %17, %18, %cst_15 {dimension_numbers = #tpu.dot_dimension_numbers<[1], [0], [0], [1], [0, 0, 1, 1], [], []>} : vector<16x32xbf16>, vector<32x256xbf16>, vector<16x256xf32> -> vector<16x256xf32>
    %20 = arith.truncf %19 : vector<16x256xf32> to vector<16x256xbf16>
    %c0_16 = arith.constant 0 : index
    %c0_17 = arith.constant 0 : index
    %21 = vector.load %arg7[%c0_16, %c0_17] : memref<256x128xbf16, #tpu.memory_space<vmem>>, vector<256x128xbf16>
    %cst_18 = arith.constant dense<0.000000e+00> : vector<16x128xf32>
    %22 = tpu.matmul %20, %21, %cst_18 {dimension_numbers = #tpu.dot_dimension_numbers<[1], [0], [0], [1], [0, 0, 1, 1], [], []>} : vector<16x256xbf16>, vector<256x128xbf16>, vector<16x128xf32> -> vector<16x128xf32>
    %c0_19 = arith.constant 0 : index
    %c0_20 = arith.constant 0 : index
    %23 = vector.load %arg8[%c0_19, %c0_20] : memref<16x128xf32, #tpu.memory_space<vmem>>, vector<16x128xf32>
    tpu.vector_store %arg8[%c0_19, %c0_20], %22 {strides = array<i32>} : memref<16x128xf32, #tpu.memory_space<vmem>>, vector<16x128xf32>,
    return
  }
  func.func @transform_0(%arg0: i32) -> (i32, i32) {
    %c0_i32 = arith.constant 0 : i32
    %c0_i32_0 = arith.constant 0 : i32
    return %arg0, %c0_i32 : i32, i32
  }
  func.func @transform_1(%arg0: i32) -> (i32, i32) {
    %c0_i32 = arith.constant 0 : i32
    %c0_i32_0 = arith.constant 0 : i32
    %c0_i32_1 = arith.constant 0 : i32
    return %c0_i32, %c0_i32_0 : i32, i32
  }
  func.func @transform_2(%arg0: i32) -> (i32, i32) {
    %c0_i32 = arith.constant 0 : i32
    %c0_i32_0 = arith.constant 0 : i32
    %c0_i32_1 = arith.constant 0 : i32
    return %c0_i32, %c0_i32_0 : i32, i32
  }
  func.func @transform_3(%arg0: i32) -> (i32, i32) {
    %c0_i32 = arith.constant 0 : i32
    %c0_i32_0 = arith.constant 0 : i32
    %c0_i32_1 = arith.constant 0 : i32
    return %c0_i32, %c0_i32_0 : i32, i32
  }
  func.func @transform_4(%arg0: i32) -> (i32, i32) {
    %c0_i32 = arith.constant 0 : i32
    %c0_i32_0 = arith.constant 0 : i32
    %c0_i32_1 = arith.constant 0 : i32
    return %c0_i32, %c0_i32_0 : i32, i32
  }
  func.func @transform_5(%arg0: i32) -> (i32, i32) {
    %c0_i32 = arith.constant 0 : i32
    %c0_i32_0 = arith.constant 0 : i32
    %c0_i32_1 = arith.constant 0 : i32
    return %c0_i32, %c0_i32_0 : i32, i32
  }
  func.func @transform_6(%arg0: i32) -> (i32, i32) {
    %c0_i32 = arith.constant 0 : i32
    %c0_i32_0 = arith.constant 0 : i32
    %c0_i32_1 = arith.constant 0 : i32
    return %c0_i32, %c0_i32_0 : i32, i32
  }
  func.func @transform_7(%arg0: i32) -> (i32, i32) {
    %c0_i32 = arith.constant 0 : i32
    %c0_i32_0 = arith.constant 0 : i32
    return %arg0, %c0_i32 : i32, i32
  }
}

</mosaic_0001>

<bundles_post_ra>
// kernel: tpu_custom_call.1
= control target key start
LH: loop header
LB: loop body
LE: loop exit
PB: predicated region body
PF: predicated region fallthrough
CT: control target
= control target key end

     0   :  { %s1831_s0 = inlined_call_operand.hbm [shape: bf16[32,192], index: 0, kind: input, shape index: {}]   ;;  %s1832_s1 = inlined_call_operand.hbm [shape: bf16[192,128], index: 1, kind: input, shape index: {}]   ;;  %s1833_s2 = inlined_call_operand.vmem [shape: f32[1,128], index: 2, kind: input, shape index: {}]   ;;  %s1834_s3 = inlined_call_operand.vmem [shape: bf16[32,16], index: 3, kind: input, shape index: {}]   ;;  %s1835_s4 = inlined_call_operand.hbm [shape: bf16[128,256], index: 4, kind: input, shape index: {}]   ;;  %s1836_s5 = inlined_call_operand.vmem [shape: bf16[16,32], index: 5, kind: input, shape index: {}]   ;;  %s1837_s6 = inlined_call_operand.hbm [shape: bf16[256,128], index: 6, kind: input, shape index: {}]   ;;  %s1838_s7 = inlined_call_operand.hbm [shape: f32[32,128], index: 7, kind: output, shape index: {}]  }
   0x1   :  { %1845 = sst [smem:[#allocation15_spill]] %s1832_s1 }
   0x2   :  { %12 = vsyncpa [#allocation3], 0 }
   0x3   :  { %14 = vsyncpa [#allocation3 + $0x1], 0 }
   0x4   :  { %15 = vsyncpa [#allocation6], 0 }
   0x5   :  { %16 = vsyncpa [#allocation9], 0 }
   0x6   :  { %17 = vsyncpa [#allocation4], 0 }
   0x7   :  { %19 = vsyncpa [#allocation4 + $0x1], 0  ;;  %s1582_s24 = smov 0   ;;  %s1584_s25 = smov 0  }
   0x8   :  { %s1586_s26 = smov 0   ;;  %s1588_s27 = smov 0  }
   0x9 LB: > { %s1603_s28 = sadd.s32 4294967295, %s1528_s27   ;;  %s1099_s29 = sadd.s32 4294967294, %s1528_s27   ;;  %s1528_s27 = sphi %s1588_s27, %s1867_s27   ;;  %s1524_s26 = sphi %s1586_s26, %s1866_s26   ;;  %s1520_s25 = sphi %s1584_s25, %s1865_s25   ;;  %s1516_s24 = sphi %s1582_s24, %s1864_s24  }
   0xa   : > { %p45_p0 = scmp.ne.s32.totalorder %s1520_s25, %s1516_s24  ;;  %p1840_p1 = scmp.eq.s32.totalorder %s1603_s28, 0 }
   0xb   : > { %p195_p2 = scmp.eq.s32.totalorder %s1603_s28, 1  ;;  %p201_p3 = scmp.eq.s32.totalorder %s1099_s29, 1 }
   0xc   : > { %p1612_p4 = por %p1840_p1, %p45_p0  ;;  %p1100_p5 = scmp.ge.s32.totalorder %s1528_s27, 1 }
   0xd   : > { %p1617_p6 = por %p201_p3, %p45_p0  ;;  %p208_p7 = scmp.lt.s32.totalorder %s1528_s27, 3 }
   0xe   : > { %s1846_s30 = scalar_select %p1612_p4, 1, 0 }
   0xf   : > { %s1847_s8 = scalar_select %p1617_p6, 1, 0 }
  0x10   : > { %p1622_p8 = pnand %p1100_p5, %p208_p7  ;;  %s1530_s10 = smov [#allocation5]  }
  0x11   : > { %s220_s11 = sshll.u32 %s1530_s10, 4  ;;  %s1531_s13 = smov [#allocation7]   ;;  %s221_s11 = int_to_ptr.vmem [resolvable:$true] %s220_s11 }
  0x12   : > { %s1848_s9 = scalar_select %p1622_p8, 1, 0 }
  0x13   : > { %p1224_p9 = pneg %p1622_p8  ;;  %s239_s14 = sshll.u32 %s1531_s13, 4  ;;  %s240_s14 = int_to_ptr.vmem [resolvable:$true] %s239_s14 }
  0x14   : > { %s1361_s15 = scalar_lea.vmem %s221_s11, 1536  ;;  %p1369_p5 = scmp.lt.s32.totalorder %s221_s11, %s221_s11 }
  0x15   : > { %p1631_p11 = pnand %p1224_p9, %p1840_p1  ;;  %p1362_p13 = scmp.ne.s32.totalorder %s221_s11, %s1361_s15 }
  0x16   : > { %p1370_p7 = scmp.lt.s32.totalorder %s1361_s15, %s1361_s15 }
  0x17   : > { %p1352_p12 = pneg %p1631_p11 }
  0x18   : > { %p1371_p10 = por %p1370_p7, %p1369_p5 }
  0x19   : > { %p1364_p0 = pnand %p1362_p13, %p1352_p12 }
  0x1b   : > { %p1365_p3 = pneg %p1364_p0 }
  0x1d   : > { %p1372_p9 = pnand %p1371_p10, %p1365_p3 }
  0x1f   : > { %1375 = shalt.err (!%p1372_p9)
}
  0x20   : > { %s1532_s16 = smov 64   ;;  %s1533_s17 = smov 4  }
  0x21   : > { %s1850_s1 = sld [smem:[#allocation15_spill]]  ;;  %s1387_s20 = scalar_lea.vmem %s240_s14, 2048 }
  0x22   : > { %p1388_p13 = scmp.ne.s32.totalorder %s240_s14, %s1387_s20  ;;  %p1395_p10 = scmp.lt.s32.totalorder %s240_s14, %s240_s14 }
  0x23   : > { %p1396_p3 = scmp.lt.s32.totalorder %s1387_s20, %s1387_s20 }
  0x24   : > { %p1390_p0 = pnand %p1388_p13, %p1352_p12 }
  0x25   : > { %p1397_p7 = por %p1396_p3, %p1395_p10 }
  0x26   : > { %p1391_p5 = pneg %p1390_p0 }
  0x27   : > { %1227 = dma.hbm_to_vmem [thread:$0]  (!%p1631_p11), %s1850_s1, 1536, %s221_s11, [#allocation6], %s1532_s16, %s1532_s16, %s1533_s17  }
  0x28   : > { %p1398_p9 = pnand %p1397_p7, %p1391_p5 }
  0x2a   : > { %1401 = shalt.err (!%p1398_p9)
}
  0x2b   : > { %s1839_s21 = smov 128   ;;  %s1841_s22 = smov 8  }
  0x2c   : > { %1230 = dma.hbm_to_vmem [thread:$0]  (!%p1631_p11), %s1835_s4, 2048, %s240_s14, [#allocation6], %s1839_s21, %s1839_s21, %s1841_s22  }
  0x2d   : > { %s1536_s10 = smov [#allocation8]   ;;  %s1660_s13 = sadd.s32 1, %s1528_s27  }
  0x2e   : > { %s255_s11 = sshll.u32 %s1536_s10, 4  ;;  %s256_s11 = int_to_ptr.vmem [resolvable:$true] %s255_s11 }
  0x2f   : > { %s1413_s15 = scalar_lea.vmem %s256_s11, 2048  ;;  %p1421_p10 = scmp.lt.s32.totalorder %s256_s11, %s256_s11 }
  0x30   : > { %p1414_p13 = scmp.ne.s32.totalorder %s256_s11, %s1413_s15  ;;  %p1422_p3 = scmp.lt.s32.totalorder %s1413_s15, %s1413_s15 }
  0x32   : > { %p1416_p0 = pnand %p1414_p13, %p1352_p12  ;;  %p1423_p7 = por %p1422_p3, %p1421_p10 }
  0x34   : > { %p1417_p5 = pneg %p1416_p0 }
  0x36   : > { %p1424_p9 = pnand %p1423_p7, %p1417_p5 }
  0x38   : > { %1427 = shalt.err (!%p1424_p9)
}
  0x39   : > { %1233 = dma.hbm_to_vmem [thread:$0]  (!%p1631_p11), %s1837_s6, 2048, %s256_s11, [#allocation9], %s1532_s16, %s1532_s16, %s1533_s17  }
  0x3a   : > { %s29_s19 = ssub.s32 %s1528_s27, %s1660_s13  ;;  %s32_s12 = sadd.s32 1, %s1524_s26 }
  0x3b   : > { %p30_p12 = scmp.eq.s32.totalorder %s29_s19, 0  ;;  %p39_p13 = scmp.ne.s32.totalorder %s1524_s26, %s1520_s25 }
  0x3c   : > { %p40_p0 = scmp.eq.s32.totalorder %s1528_s27, 0  ;;  %p1245_p5 = scmp.lt.s32.totalorder %s1528_s27, 2 }
  0x3d   : > { %s1681_s20 = scalar_select %p30_p12, %s1524_s26, %s32_s12  }
  0x3e   : > { %p41_p10 = por %p40_p0, %p39_p13  ;;  %p1685_p3 = por %p195_p2, %p39_p13 }
  0x3f   : > { %s269_s29 = sand.u32 1, %s1524_s26   ;;  %s1175_s10 = sshll.u32 %s1528_s27, 8 }
  0x40   : > { %s1851_s23 = scalar_select %p1685_p3, 1, 0 }
  0x41   : > { %s1105_s15 = sshll.u32 %s269_s29, 4  ;;  %s1694_s16 = scalar_lea.hbm %s1831_s0, %s1175_s10 }
  0x42   : > { %s273_s17 = scalar_lea.vmem [#allocation2], %s1105_s15  ;;  %p1696_p11 = pnand %p1245_p5, %p41_p10 }
  0x43   : > { %s281_s11 = sshll.u32 %s273_s17, 4  ;;  %s1702_s12 = scalar_lea.sflag [#allocation3], %s269_s29  ;;  %s1700_s11 = int_to_ptr.vmem [resolvable:$true] %s281_s11 }
  0x44   : > { %s1428_s21 = scalar_lea.hbm %s1694_s16, 256  ;;  %p1430_p7 = pneg %p1696_p11 }
  0x45   : > { %p1429_p2 = scmp.ne.s32.totalorder %s1694_s16, %s1428_s21  ;;  %s1433_s15 = scalar_lea.hbm %s1831_s0, 512 }
  0x46   : > { %p1434_p13 = scmp.lt.s32.totalorder %s1694_s16, %s1831_s0  ;;  %p1435_p0 = scmp.lt.s32.totalorder %s1433_s15, %s1428_s21 }
  0x47   : > { %p1431_p9 = pnand %p1430_p7, %p1429_p2 }
  0x48   : > { %p1436_p5 = por %p1435_p0, %p1434_p13 }
  0x49   : > { %p1432_p12 = pneg %p1431_p9 }
  0x4b   : > { %p1437_p10 = pnand %p1436_p5, %p1432_p12 }
  0x4d   : > { %1440 = shalt.err (!%p1437_p10)
}
  0x4e   : > { %s1441_s29 = scalar_lea.vmem %s1700_s11, 256  ;;  %s1537_s22 = smov [#allocation2]  }
  0x4f   : > { %p1442_p1 = scmp.ne.s32.totalorder %s1700_s11, %s1441_s29  ;;  %s1446_s1 = sshll.u32 %s1537_s22, 4  ;;  %s1447_s1 = int_to_ptr.vmem [resolvable:$false] %s1446_s1 }
  0x50   : > { %s1448_s10 = scalar_lea.vmem %s1447_s1, 512  ;;  %p1449_p9 = scmp.lt.s32.totalorder %s1700_s11, %s1447_s1 }
  0x51   : > { %p1444_p6 = pnand %p1442_p1, %p1430_p7  ;;  %p1450_p3 = scmp.lt.s32.totalorder %s1448_s10, %s1441_s29 }
  0x53   : > { %p1445_p2 = pneg %p1444_p6  ;;  %p1451_p4 = por %p1450_p3, %p1449_p9 }
  0x55   : > { %p1452_p8 = pnand %p1451_p4, %p1445_p2 }
  0x57   : > { %1455 = shalt.err (!%p1452_p8)
}
  0x58   : > { %s1853_s21 = smov 8   ;;  %s1854_s14 = smov 128  }
  0x59   : > { %1237 = dma.hbm_to_vmem [thread:$0]  (!%p1696_p11), %s1694_s16, 256, %s1700_s11, %s1702_s12, %s1854_s14, %s1854_s14, %s1853_s21  }
  0x5a   : > { %p1855_p1 = scmp.ne.s32.totalorder %s1848_s9, 0 }
  0x5b   : > { %s1729_s22 = sand.u32 (!%p1855_p1), 1, %s1520_s25   ;;  %p1856_p4 = scmp.ne.s32.totalorder (!%p1855_p1), %s1846_s30, 0 }
  0x5c   : > { %293 = sbr.rel (%p1855_p1) target bundleno = 1196 (0x4ac), region = 48  ;;  %s1110_s1 = sshll.u32 (!%p1855_p1), %s1729_s22, 4 }
  0x5d   : > { %s296_s15 = scalar_lea.sflag (!%p1855_p1), [#allocation3], %s1729_s22  ;;  %s1735_s19 = scalar_lea.vmem (!%p1855_p1), [#allocation2], %s1110_s1 }
  0x61   : > { %1499 = dma.done.wait (%p1856_p4), %s296_s15, 256  }
  0x62   : > { %1501 = vsyncadd (%p1856_p4), %s296_s15, 4294967040  ;;  %p1857_p6 = scmp.eq.s32.totalorder %s1603_s28, 0 }
  0x64   : > { %1503 = dma.done.wait (%p1857_p6), [#allocation6], 3584   ;;  %p1858_p8 = pmov %p1857_p6 }
  0x65   : > { %p1859_p3 = pmov %p1857_p6 }
  0x66   : > { %1505 = vsyncadd (%p1858_p8), [#allocation6], 4294963712 }
  0x67   : > { %1507 = dma.done.wait (%p1859_p3), [#allocation9], 2048   ;;  %p1860_p11 = pmov %p1859_p3 }
  0x68   : > { %v1538_v0 = vmov 0   ;;  %v1292_v1 = vld [vmem:[#allocation5 + $0x38] sm:$0xff]   ;;  %v1293_v2 = vld [vmem:[#allocation5 + $0x30] sm:$0xff]   ;;  %v1294_v3 = vld [vmem:[#allocation5 + $0x28] sm:$0xff]   ;;  %vm453_vm0 = vcmask 523264   ;;  %vm521_vm1 = vcmask 130048  }
  0x69   : > { %1509 = vsyncadd (%p1860_p11), [#allocation9], 4294965248  ;;  %457 = vmatprep.subr.bf16.mxu0 %v1538_v0  ;;  %v1295_v4 = vld [vmem:[#allocation5 + $0x20] sm:$0xff]   ;;  %v1296_v5 = vld [vmem:[#allocation5 + $0x18] sm:$0xff]   ;;  %vm763_vm10 = vcmask 261120   ;;  %s341_s10 = scalar_lea.vmem [#allocation10], %s1110_s1 }
  0x6a   : > { %458 = vmatpush1.bf16.msra.mxu0 %v1292_v1  ;;  %v1306_v6 = vld [vmem:[%s1735_s19 + $0x4] ss:$8 sps:$4 sm:$0xff]   ;;  %v1304_v14 = vld [vmem:[%s1735_s19] ss:$8 sps:$4 sm:$0xff]   ;;  %s997_s21 = sshll.u32 %s341_s10, 4  ;;  %s1176_s14 = sshll.u32 %s1603_s28, 8  ;;  %s1783_s21 = int_to_ptr.vmem [resolvable:$true] %s997_s21 }
  0x6b   : > { %459 = vmatprep.subr.bf16.mxu0 %v1538_v0  ;;  %1129 = vmatprep.mubr.msk.bf16.mxu0 %vm453_vm0, %v1306_v6  ;;  %v1297_v7 = vld [vmem:[#allocation5 + $0x10] sm:$0xff]   ;;  %v1298_v8 = vld [vmem:[#allocation5 + $0x8] sm:$0xff]   ;;  %v1299_v9 = vld [vmem:[#allocation5] sm:$0xff]   ;;  %s1788_s30 = scalar_lea.hbm %s1838_s7, %s1176_s14  ;;  %s984_s9 = scalar_lea.sflag [#allocation4], %s1729_s22 }
  0x6c   : > { %v1300_v10 = vld [vmem:[#allocation5 + $0x58] sm:$0xff]   ;;  %v1301_v11 = vld [vmem:[#allocation5 + $0x50] sm:$0xff]   ;;  %v1302_v12 = vld [vmem:[#allocation5 + $0x48] sm:$0xff]   ;;  %s1456_s1 = scalar_lea.vmem %s1783_s21, 256  ;;  %p1861_p12 = scmp.ne.s32.totalorder %s1851_s23, 0 }
  0x6d   : > { %v1303_v13 = vld [vmem:[#allocation5 + $0x40] sm:$0xff]   ;;  %v1311_v24 = vld [vmem:[#allocation7 + $0x74] ss:$8 sps:$4 sm:$0xff]   ;;  %v1308_v25 = vld [vmem:[%s1834_s3 + $0x8] sm:$0xff]   ;;  %p1457_p7 = scmp.ne.s32.totalorder %s1783_s21, %s1456_s1  ;;  %s1539_s28 = smov [#allocation10]  }
  0x6e   : > { %460 = vmatpush1.bf16.msra.mxu0 %v1293_v2  ;;  %v1307_v15 = vld [vmem:[%s1834_s3] sm:$0xff]   ;;  %v1309_v26 = vld [vmem:[#allocation7 + $0x70] ss:$8 sps:$4 sm:$0xff]   ;;  %v1317_v29 = vld [vmem:[#allocation7 + $0x54] ss:$8 sps:$4 sm:$0xff]   ;;  %s1460_s16 = sshll.u32 %s1539_s28, 4  ;;  %s1461_s16 = int_to_ptr.vmem [resolvable:$false] %s1460_s16 }
  0x6f   : > { %461 = vmatprep.subr.bf16.mxu0 %v1538_v0  ;;  %1204 = vmatprep.mubr.msk.bf16.mxu1 %vm521_vm1, %v1307_v15  ;;  %v1130_v17 = vld [vmem:[%s1833_s2] ss:$0 sm:$0xff]  ;;  %v1314_v27 = vld [vmem:[#allocation7 + $0x64] ss:$8 sps:$4 sm:$0xff]   ;;  %v1315_v30 = vld [vmem:[#allocation7 + $0x50] ss:$8 sps:$4 sm:$0xff]   ;;  %p1458_p13 = pnand %p1457_p7, %p1861_p12  ;;  %p1463_p5 = scmp.lt.s32.totalorder %s1783_s21, %s1461_s16 }
  0x70   : > { %v1312_v28 = vld [vmem:[#allocation7 + $0x60] ss:$8 sps:$4 sm:$0xff]   ;;  %v1320_v31 = vld [vmem:[#allocation7 + $0x44] ss:$8 sps:$4 sm:$0xff]   ;;  %v1323_v33 = vld [vmem:[#allocation7 + $0x34] ss:$8 sps:$4 sm:$0xff]  }
  0x71   : > { %v1318_v32 = vld [vmem:[#allocation7 + $0x40] ss:$8 sps:$4 sm:$0xff]   ;;  %v1321_v34 = vld [vmem:[#allocation7 + $0x30] ss:$8 sps:$4 sm:$0xff]   ;;  %v1326_v35 = vld [vmem:[#allocation7 + $0x24] ss:$8 sps:$4 sm:$0xff]   ;;  %p1459_p0 = pneg %p1458_p13 }
  0x72   : > { %462 = vmatpush1.bf16.msra.mxu0 %v1294_v3  ;;  %v1324_v36 = vld [vmem:[#allocation7 + $0x20] ss:$8 sps:$4 sm:$0xff]   ;;  %v1329_v37 = vld [vmem:[#allocation7 + $0x14] ss:$8 sps:$4 sm:$0xff]   ;;  %v1327_v38 = vld [vmem:[#allocation7 + $0x10] ss:$8 sps:$4 sm:$0xff]  }
  0x73   : > { %463 = vmatprep.subr.bf16.mxu0 %v1538_v0  ;;  %v1332_v39 = vld [vmem:[#allocation7 + $0x4] ss:$8 sps:$4 sm:$0xff]   ;;  %v1330_v40 = vld [vmem:[#allocation7] ss:$8 sps:$4 sm:$0xff]   ;;  %v1334_v47 = vld [vmem:[#allocation8 + $0x78] sm:$0xff]   ;;  %s1462_s11 = scalar_lea.vmem %s1461_s16, 512 }
  0x74   : > { %v1335_v48 = vld [vmem:[#allocation8 + $0x38] sm:$0xff]   ;;  %v1336_v49 = vld [vmem:[#allocation8 + $0x70] sm:$0xff]   ;;  %v1338_v51 = vld [vmem:[#allocation8 + $0x68] sm:$0xff]   ;;  %p1464_p10 = scmp.lt.s32.totalorder %s1462_s11, %s1456_s1 }
  0x75   : > { %v1337_v50 = vld [vmem:[#allocation8 + $0x30] sm:$0xff]   ;;  %v1339_v52 = vld [vmem:[#allocation8 + $0x28] sm:$0xff]   ;;  %v1340_v53 = vld [vmem:[#allocation8 + $0x60] sm:$0xff]  }
  0x76   : > { %464 = vmatpush1.bf16.msra.mxu0 %v1295_v4  ;;  %v1341_v54 = vld [vmem:[#allocation8 + $0x20] sm:$0xff]   ;;  %v1342_v55 = vld [vmem:[#allocation8 + $0x58] sm:$0xff]   ;;  %v1344_v57 = vld [vmem:[#allocation8 + $0x50] sm:$0xff]   ;;  %p1465_p2 = por %p1464_p10, %p1463_p5 }
  0x77   : > { %465 = vmatprep.subr.bf16.mxu0 %v1538_v0  ;;  %v1343_v56 = vld [vmem:[#allocation8 + $0x18] sm:$0xff]   ;;  %v1345_v58 = vld [vmem:[#allocation8 + $0x10] sm:$0xff]  }
  0x78   : > { %p1466_p9 = pnand %p1465_p2, %p1459_p0 }
  0x7a   : > { %466 = vmatpush1.bf16.msra.mxu0 %v1296_v5 }
  0x7b   : > { %467 = vmatprep.subr.bf16.mxu0 %v1538_v0 }
  0x7e   : > { %468 = vmatpush1.bf16.msra.mxu0 %v1297_v7 }
  0x7f   : > { %469 = vmatprep.subr.bf16.mxu0 %v1538_v0 }
  0x82   : > { %470 = vmatpush1.bf16.msra.mxu0 %v1298_v8 }
  0x83   : > { %471 = vmatprep.subr.bf16.mxu0 %v1538_v0 }
  0x86   : > { %472 = vmatpush1.bf16.msra.mxu0 %v1299_v9 }
  0x87   : > { %481 = vmatprep.subr.bf16.mxu0 %v1538_v0 }
  0x8a   : > { %482 = vmatpush2.bf16.msra.mxu0 %v1300_v10 }
  0x8b   : > { %483 = vmatprep.subr.bf16.mxu0 %v1538_v0 }
  0x8e   : > { %484 = vmatpush2.bf16.msra.mxu0 %v1301_v11 }
  0x8f   : > { %485 = vmatprep.subr.bf16.mxu0 %v1538_v0 }
  0x92   : > { %486 = vmatpush2.bf16.msra.mxu0 %v1302_v12 }
  0x93   : > { %487 = vmatprep.subr.bf16.mxu0 %v1538_v0 }
  0x96   : > { %488 = vmatpush2.bf16.msra.mxu0 %v1303_v13 }
  0x97   : > { %1180 = vmatprep.subr.bf16.mxu0 %v1334_v47 }
  0x99   : > { %490 = vmatmul.mubr.bf16.vlgmr.msra.gmra.mxu0 %v1304_v14 }
  0x9a   : > { %1181 = vmatpush3.bf16.msra.mxu0 %v1335_v48 }
  0x9b   : > { %1182 = vmatprep.subr.bf16.mxu0 %v1336_v49 }
  0x9e   : > { %1183 = vmatpush3.bf16.msra.mxu0 %v1337_v50 }
  0x9f   : > { %1184 = vmatprep.subr.bf16.mxu0 %v1338_v51 }
  0xa2   : > { %1185 = vmatpush3.bf16.msra.mxu0 %v1339_v52 }
  0xa3   : > { %1186 = vmatprep.subr.bf16.mxu0 %v1340_v53 }
  0xa6   : > { %1187 = vmatpush3.bf16.msra.mxu0 %v1341_v54 }
  0xa7   : > { %1188 = vmatprep.subr.bf16.mxu0 %v1342_v55 }
  0xaa   : > { %1189 = vmatpush3.bf16.msra.mxu0 %v1343_v56 }
  0xab   : > { %1190 = vmatprep.subr.bf16.mxu0 %v1344_v57 }
  0xae   : > { %1191 = vmatpush3.bf16.msra.mxu0 %v1345_v58 }
 0x159   : > { %v491_v16 = vpop.f32.mrf.mxu0 }
 0x15a   : > { %v504_v20 = vadd.f32 %v1130_v17, %v491_v16 }
 0x15b   : > { %v493_v18 = vpop.f32.mrf.mxu0 }
 0x15d   : > { %v494_v19 = vpop.f32.mrf.mxu0 }
 0x15e   : > { %v505_v21 = vadd.f32 %v1130_v17, %v494_v19 }
 0x15f   : > { %v496_v22 = vpop.f32.mrf.mxu0 }
 0x160   : > { %v510_v23 = vpack.c.bf16 %v505_v21, %v504_v20 }
 0x162   : > { %1202 = vmatprep.subr.bf16.mxu1 %v510_v23 }
 0x163   : > { %1203 = vmatpush3.bf16.msra.mxu1 %v510_v23  ;;  %v1333_v23 = vld [vmem:[%s1836_s5] sm:$0xff]  }
 0x164   : > { %675 = vmatprep.subr.bf16.mxu1 %v1311_v24  ;;  %v1346_v24 = vld [vmem:[#allocation8 + $0x48] sm:$0xff]  }
 0x165   : > { %1192 = vmatprep.subr.bf16.mxu0 %v1346_v24 }
 0x166   : > { %1205 = vmatmul.mubr.msk.bf16.vlgmr.msra.gmra.mxu1 %vm521_vm1, %v1308_v25  ;;  %v1347_v25 = vld [vmem:[#allocation8 + $0x8] sm:$0xff]  }
 0x167   : > { %676 = vmatpush1.bf16.msra.mxu1 %v1309_v26  ;;  %707 = vmatprep.mubr.bf16.mxu1 %v1538_v0  ;;  %v1348_v26 = vld [vmem:[#allocation8 + $0x40] sm:$0xff]  }
 0x168   : > { %677 = vmatprep.subr.bf16.mxu1 %v1314_v27  ;;  %1193 = vmatpush3.bf16.msra.mxu0 %v1347_v25  ;;  %v1349_v27 = vld [vmem:[#allocation8] sm:$0xff]  }
 0x169   : > { %1194 = vmatprep.subr.bf16.mxu0 %v1348_v26 }
 0x16b   : > { %678 = vmatpush1.bf16.msra.mxu1 %v1312_v28 }
 0x16c   : > { %679 = vmatprep.subr.bf16.mxu1 %v1317_v29  ;;  %1195 = vmatpush3.bf16.msra.mxu0 %v1349_v27 }
 0x16f   : > { %680 = vmatpush1.bf16.msra.mxu1 %v1315_v30 }
 0x170   : > { %681 = vmatprep.subr.bf16.mxu1 %v1320_v31 }
 0x173   : > { %682 = vmatpush1.bf16.msra.mxu1 %v1318_v32 }
 0x174   : > { %683 = vmatprep.subr.bf16.mxu1 %v1323_v33 }
 0x177   : > { %684 = vmatpush1.bf16.msra.mxu1 %v1321_v34 }
 0x178   : > { %685 = vmatprep.subr.bf16.mxu1 %v1326_v35 }
 0x17b   : > { %686 = vmatpush1.bf16.msra.mxu1 %v1324_v36 }
 0x17c   : > { %687 = vmatprep.subr.bf16.mxu1 %v1329_v37 }
 0x17f   : > { %688 = vmatpush1.bf16.msra.mxu1 %v1327_v38 }
 0x180   : > { %689 = vmatprep.subr.bf16.mxu1 %v1332_v39 }
 0x183   : > { %690 = vmatpush1.bf16.msra.mxu1 %v1330_v40 }
 0x226   : > { %v1206_v41 = vpop.f32.mrf.mxu1 }
 0x228   : > { %v562_v42 = vpop.f32.mrf.mxu1 }
 0x22a   : > { %v1207_v43 = vpop.f32.mrf.mxu1 }
 0x22b   : > { %v578_v46 = vpack.c.bf16 %v1207_v43, %v1206_v41 }
 0x22c   : > { %v565_v44 = vpop.f32.mrf.mxu1 }
 0x22d   : > { %v577_v45 = vpack.c.bf16 %v565_v44, %v562_v42 }
 0x22f   : > { %708 = vmatmul.mubr.bf16.vlgmr.msra.gmra.mxu1 %v577_v45 }
 0x230   : > { %717 = vmatprep.mubr.bf16.mxu1 %v1538_v0 }
 0x237   : > { %718 = vmatmul.mubr.bf16.gmra.mxu1 %v578_v46 }
 0x238   : > { %799 = vmatprep.mubr.bf16.mxu1 %v1538_v0 }
 0x2ef   : > { %v709_v59 = vpop.f32.mrf.mxu1 }
 0x2f0   : > { %v736_v14 = vmul.f32 0.01, %v709_v59  ;;  %vm728_vm9 = vcmp.ge.f32.partialorder %v709_v59, 0.0 }
 0x2f1   : > { %v711_v60 = vpop.f32.mrf.mxu1 }
 0x2f2   : > { %v737_v7 = vmul.f32 0.01, %v711_v60  ;;  %vm729_vm7 = vcmp.ge.f32.partialorder %v711_v60, 0.0  ;;  %v744_v21 = vsel %vm728_vm9, %v709_v59, %v736_v14 }
 0x2f3   : > { %v713_v61 = vpop.f32.mrf.mxu1 }
 0x2f4   : > { %v738_v9 = vmul.f32 0.01, %v713_v61  ;;  %vm730_vm8 = vcmp.ge.f32.partialorder %v713_v61, 0.0  ;;  %v745_v17 = vsel %vm729_vm7, %v711_v60, %v737_v7 }
 0x2f5   : > { %v715_v62 = vpop.f32.mrf.mxu1 }
 0x2f6   : > { %v739_v1 = vmul.f32 0.01, %v715_v62  ;;  %vm731_vm3 = vcmp.ge.f32.partialorder %v715_v62, 0.0  ;;  %v746_v19 = vsel %vm730_vm8, %v713_v61, %v738_v9 }
 0x2f7   : > { %v719_v63 = vpop.f32.mrf.mxu1  ;;  %v754_v22 = vpack.c.bf16 %v746_v19, %v744_v21 }
 0x2f8   : > { %v740_v5 = vmul.f32 0.01, %v719_v63  ;;  %vm732_vm5 = vcmp.ge.f32.partialorder %v719_v63, 0.0  ;;  %v747_v11 = vsel %vm731_vm3, %v715_v62, %v739_v1 }
 0x2f9   : > { %v721_v0 = vpop.f32.mrf.mxu1  ;;  %v755_v20 = vpack.c.bf16 %v747_v11, %v745_v17 }
 0x2fa   : > { %v741_v3 = vmul.f32 0.01, %v721_v0  ;;  %vm733_vm4 = vcmp.ge.f32.partialorder %v721_v0, 0.0  ;;  %v748_v15 = vsel %vm732_vm5, %v719_v63, %v740_v5 }
 0x2fb   : > { %v723_v2 = vpop.f32.mrf.mxu1 }
 0x2fc   : > { %vm734_vm2 = vcmp.ge.f32.partialorder %v723_v2, 0.0  ;;  %v742_v4 = vmul.f32 0.01, %v723_v2  ;;  %v749_v12 = vsel %vm733_vm4, %v721_v0, %v741_v3 }
 0x2fd   : > { %v725_v6 = vpop.f32.mrf.mxu1 }
 0x2fe   : > { %vm735_vm6 = vcmp.ge.f32.partialorder %v725_v6, 0.0  ;;  %v743_v8 = vmul.f32 0.01, %v725_v6  ;;  %v750_v10 = vsel %vm734_vm2, %v723_v2, %v742_v4 }
 0x2ff   : > { %v756_v18 = vpack.c.bf16 %v750_v10, %v748_v15 }
 0x300   : > { %v751_v13 = vsel %vm735_vm6, %v725_v6, %v743_v8 }
 0x301   : > { %v757_v16 = vpack.c.bf16 %v751_v13, %v749_v12 }
 0x303   : > { %779 = vmatprep.subr.bf16.mxu1 %v757_v16 }
 0x304   : > { %780 = vmatpush1.bf16.msra.mxu1 %v756_v18 }
 0x305   : > { %781 = vmatprep.subr.bf16.mxu1 %v755_v20 }
 0x308   : > { %782 = vmatpush1.bf16.msra.mxu1 %v754_v22 }
 0x30b   : > { %1152 = vmatmul.mubr.msk.bf16.vlgmr.msra.gmra.mxu1 %vm763_vm10, %v1333_v23 }
 0x3cb   : > { %v801_v28 = vpop.f32.mrf.mxu1 }
 0x3cd   : > { %v803_v29 = vpop.f32.mrf.mxu1 }
 0x3cf   : > { %v805_v30 = vpop.f32.mrf.mxu1 }
 0x3d0   : > { %v810_v33 = vpack.c.bf16 %v805_v30, %v801_v28 }
 0x3d1   : > { %v807_v31 = vpop.f32.mrf.mxu1 }
 0x3d2   : > { %v811_v32 = vpack.c.bf16 %v807_v31, %v803_v29 }
 0x3d4   : > { %972 = vmatprep.mubr.bf16.mxu0 %v811_v32 }
 0x3d5   : > { %973 = vmatmul.mubr.bf16.vlgmr.msra.gmra.mxu0 %v810_v33 }
 0x495   : > { %v1196_v34 = vpop.f32.mrf.mxu0 }
 0x497   : > { %v1197_v35 = vpop.f32.mrf.mxu0 }
 0x498   : > { %v1198_v36 = vadd.f32 %v1197_v35, %v1196_v34 }
 0x499   : > { %v1199_v37 = vpop.f32.mrf.mxu0 }
 0x49a   : > { %981 = vst [vmem:[%s341_s10] sm:$0xff] %v1198_v36 }
 0x49b   : > { %v1200_v38 = vpop.f32.mrf.mxu0 }
 0x49c   : > { %v1201_v39 = vadd.f32 %v1200_v38, %v1199_v37 }
 0x49e   : > { %982 = vst [vmem:[%s341_s10 + $0x8] sm:$0xff] %v1201_v39 }
 0x49f   : > { %1469 = shalt.err (!%p1466_p9)
}
 0x4a0   : > { %s1470_s12 = scalar_lea.hbm %s1788_s30, 256  ;;  %s1474_s29 = scalar_lea.hbm %s1838_s7, 512 }
 0x4a1   : > { %p1471_p1 = scmp.ne.s32.totalorder %s1788_s30, %s1470_s12  ;;  %p1475_p8 = scmp.lt.s32.totalorder %s1788_s30, %s1838_s7 }
 0x4a2   : > { %p1476_p3 = scmp.lt.s32.totalorder %s1474_s29, %s1470_s12 }
 0x4a3   : > { %p1472_p4 = pnand %p1471_p1, %p1861_p12 }
 0x4a4   : > { %p1477_p11 = por %p1476_p3, %p1475_p8 }
 0x4a5   : > { %p1473_p6 = pneg %p1472_p4 }
 0x4a7   : > { %p1478_p7 = pnand %p1477_p11, %p1473_p6 }
 0x4a9   : > { %1481 = shalt.err (!%p1478_p7)
}
 0x4aa   : > { %s1540_s15 = smov 128   ;;  %s1541_s19 = smov 8  }
 0x4ab   : > { %1222 = dma.vmem_to_hbm [thread:$0]  (%p1861_p12), %s1783_s21, 256, %s1788_s30, %s984_s9, %s1540_s15, %s1540_s15, %s1541_s19  }
 0x4ac PF: > { %s1012_s1 = sand.u32 1, %s1516_s24   ;;  %p1862_p13 = scmp.ne.s32.totalorder %s1847_s8, 0 }
 0x4ad   : > { %p1863_p0 = scmp.ge.s32.totalorder %s1528_s27, 2  ;;  %s1013_s28 = scalar_lea.sflag [#allocation4], %s1012_s1 }
 0x4af   : > { %p1239_p5 = pnand %p1863_p0, %p1862_p13 }
 0x4b1   : > { %p1240_p10 = pneg %p1239_p5 }
 0x4b3   : > { %1511 = dma.done.wait (%p1240_p10), %s1013_s28, 256  }
 0x4b4   : > { %1513 = vsyncadd (%p1240_p10), %s1013_s28, 4294967040  ;;  %p22_p2 = scmp.ge.s32.totalorder %s1660_s13, 4   ;;  %s1864_s24 = smov %s1520_s25 }
 0x4b5   : > { %s1865_s25 = smov %s1524_s26  ;;  %s1866_s26 = smov %s1681_s20 }
 0x4b6   : > { %s1867_s27 = smov %s1660_s13  ;;  %24 = sbr.rel (!%p22_p2) target bundleno = 9 (0x9), region = 105 }
 0x4bb   :  { %1018 = vsyncpa [#allocation3], 1 }
 0x4bc   :  { %1020 = vsyncpa [#allocation3 + $0x1], 1 }
 0x4bd   :  { %1021 = vsyncpa [#allocation6], 1 }
 0x4be   :  { %1022 = vsyncpa [#allocation9], 1 }
 0x4bf   :  { %1023 = vsyncpa [#allocation4], 1 }
 0x4c0   :  { %1025 = vsyncpa [#allocation4 + $0x1], 1 }

</bundles_post_ra>
